<compile_context>
chip_gen: v5e
topology: v5e:2x2
jax: 0.10.0
libtpu: 0.0.40
codegen_flags: <defaults>
</compile_context>

<pallas_src>
import functools

import jax
import jax.numpy as jnp
from jax.experimental import pallas as pl
from jax.experimental.pallas import tpu as pltpu

NUM_CLASSES = 40  # matches ResNet(num_classes=40, model_name='resnet18')


def _round_up(x, m):
    return (x + m - 1) // m * m


def _pick_k_tiling(K, max_tk=2304):
    """Return (Kp, tk).  Single full-extent K step when it fits, otherwise the
    128-multiple slab size minimizing (#steps, padded waste)."""
    if K <= max_tk:
        return K, K
    best = None
    for tk in range(128, max_tk + 1, 128):
        steps = -(-K // tk)
        kp = steps * tk
        key = (steps, kp)
        if best is None or key < best[0]:
            best = (key, kp, tk)
    return best[1], best[2]


# ----------------------------------------------------------------------------
# Pallas kernels
# ----------------------------------------------------------------------------
def _fused_matmul_kernel(a_ref, b_ref, scale_ref, bias_ref, o_ref, acc_ref, *,
                         apply_relu):
    """acc (f32 VMEM scratch) accumulates A@B over K; bf16 epilogue with BN."""
    k = pl.program_id(2)

    @pl.when(k == 0)
    def _():
        acc_ref[...] = jnp.zeros_like(acc_ref)

    acc_ref[...] += jnp.dot(a_ref[...], b_ref[...],
                            preferred_element_type=jnp.float32)

    @pl.when(k == pl.num_programs(2) - 1)
    def _():
        y = acc_ref[...] * scale_ref[...] + bias_ref[...]
        if apply_relu:
            y = jnp.maximum(y, 0.0)
        o_ref[...] = y.astype(o_ref.dtype)


def _fused_matmul_res_kernel(a_ref, b_ref, scale_ref, bias_ref, res_ref,
                             o_ref, acc_ref, *, apply_relu):
    """Same as above with a fused (bf16) residual add in the epilogue."""
    k = pl.program_id(2)

    @pl.when(k == 0)
    def _():
        acc_ref[...] = jnp.zeros_like(acc_ref)

    acc_ref[...] += jnp.dot(a_ref[...], b_ref[...],
                            preferred_element_type=jnp.float32)

    @pl.when(k == pl.num_programs(2) - 1)
    def _():
        y = (acc_ref[...] * scale_ref[...] + bias_ref[...]
             + res_ref[...].astype(jnp.float32))
        if apply_relu:
            y = jnp.maximum(y, 0.0)
        o_ref[...] = y.astype(o_ref.dtype)


def _maxpool_kernel(p_ref, o_ref):
    # p_ref: (kh*kw, tp, C) stacked shifted views -> max over window axis.
    o_ref[...] = jnp.max(p_ref[...], axis=0)


# ----------------------------------------------------------------------------
# Pallas wrappers
# ----------------------------------------------------------------------------
def fused_matmul(a, b, scale, bias, residual=None, apply_relu=False,
                 out_dtype=jnp.bfloat16, tm=256, tn=256, max_tk=2304):
    """out = maybe_relu((a @ b) * scale + bias [+ residual]); bf16 output.

    a: (P, K) bf16 activation rows (im2col).
    b: (K, Cp) bf16 weight matrix, channel-padded at init (Cp % 128 == 0).
    scale/bias: (1, Cp) f32 folded BN params, padded with zeros.
    residual: optional (P, Cp) bf16.
    """
    P, K = a.shape
    Kb, Cp = b.shape
    assert K == Kb and Cp % 128 == 0

    tm_eff = min(tm, _round_up(max(P, 16), 16))
    Pp = _round_up(P, tm_eff)
    tn_eff = min(tn, Cp)
    Kp, tk = _pick_k_tiling(K, max_tk)

    a_p = a.astype(jnp.bfloat16)
    if (Pp, Kp) != (P, K):
        a_p = jnp.zeros((Pp, Kp), jnp.bfloat16).at[:P, :K].set(a_p)
    b_p = b
    if Kp != K:
        b_p = jnp.zeros((Kp, Cp), jnp.bfloat16).at[:K, :].set(b_p)

    grid = (Pp // tm_eff, Cp // tn_eff, Kp // tk)
    p_tiles, c_tiles = grid[0], grid[1]

    in_specs = [
        pl.BlockSpec((tm_eff, tk), lambda i, j, k: (i, k)),
        pl.BlockSpec((tk, tn_eff), lambda i, j, k: (k, j)),
        pl.BlockSpec((1, tn_eff), lambda i, j, k: (0, j)),
        pl.BlockSpec((1, tn_eff), lambda i, j, k: (0, j)),
    ]
    operands = [a_p, b_p, scale, bias]
    res_bytes = 0
    if residual is not None:
        res_p = residual.astype(jnp.bfloat16)
        if res_p.shape != (Pp, Cp):
            res_p = jnp.zeros((Pp, Cp), jnp.bfloat16).at[:P, :].set(res_p)
        in_specs.append(pl.BlockSpec((tm_eff, tn_eff), lambda i, j, k: (i, j)))
        operands.append(res_p)
        kernel = functools.partial(_fused_matmul_res_kernel,
                                   apply_relu=apply_relu)
        res_bytes = Pp * Cp * 2
    else:
        kernel = functools.partial(_fused_matmul_kernel, apply_relu=apply_relu)

    cost = pl.CostEstimate(
        flops=2 * Pp * Kp * Cp,
        transcendentals=0,
        bytes_accessed=(Pp * Kp * 2 * c_tiles        # A re-read per Cout tile
                        + Kp * Cp * 2 * p_tiles      # B re-read per P tile
                        + Pp * Cp * jnp.dtype(out_dtype).itemsize
                        + res_bytes),
    )

    out = pl.pallas_call(
        kernel,
        out_shape=jax.ShapeDtypeStruct((Pp, Cp), out_dtype),
        grid_spec=pltpu.PrefetchScalarGridSpec(
            num_scalar_prefetch=0,
            grid=grid,
            in_specs=in_specs,
            out_specs=pl.BlockSpec((tm_eff, tn_eff), lambda i, j, k: (i, j)),
            scratch_shapes=[pltpu.VMEM((tm_eff, tn_eff), jnp.float32)],
        ),
        compiler_params=pltpu.CompilerParams(
            dimension_semantics=("parallel", "parallel", "arbitrary"),
            vmem_limit_bytes=32 * 1024 * 1024),
        cost_estimate=cost,
    )(*operands)

    if Pp != P:
        out = out[:P, :]
    return out


def maxpool2d_3x3_s2_p1(x_nhwc, tp=256):
    """PyTorch MaxPool2d(kernel_size=3, stride=2, padding=1) on bf16 NHWC."""
    N, H, W, C = x_nhwc.shape
    k, s, pad = 3, 2, 1
    Ho = (H + 2 * pad - k) // s + 1
    Wo = (W + 2 * pad - k) // s + 1
    xp = jnp.pad(x_nhwc, ((0, 0), (pad, pad), (pad, pad), (0, 0)),
                 constant_values=-jnp.inf)
    # TODO(synk): the 9-view stack is still a kh*kw-fold HBM materialization
    # (now bf16); an in-kernel shifted-window gather would remove it entirely.
    views = [xp[:, i:i + s * Ho:s, j:j + s * Wo:s, :].reshape(N * Ho * Wo, C)
             for i in range(k) for j in range(k)]
    stacked = jnp.stack(views, axis=0)  # (9, P, C) bf16

    P = N * Ho * Wo
    tp_eff = min(tp, _round_up(max(P, 16), 16))
    Pp = _round_up(P, tp_eff)
    assert C % 128 == 0
    if Pp != P:
        stacked = jnp.full((k * k, Pp, C), -jnp.inf,
                           x_nhwc.dtype).at[:, :P, :].set(stacked)

    out = pl.pallas_call(
        _maxpool_kernel,
        out_shape=jax.ShapeDtypeStruct((Pp, C), x_nhwc.dtype),
        grid_spec=pltpu.PrefetchScalarGridSpec(
            num_scalar_prefetch=0,
            grid=(Pp // tp_eff,),
            in_specs=[pl.BlockSpec((k * k, tp_eff, C), lambda i: (0, i, 0))],
            out_specs=pl.BlockSpec((tp_eff, C), lambda i: (i, 0)),
        ),
        compiler_params=pltpu.CompilerParams(
            dimension_semantics=("parallel",)),
    )(stacked)
    if Pp != P:
        out = out[:P, :]
    return out.reshape(N, Ho, Wo, C)


# ----------------------------------------------------------------------------
# Model glue (im2col, blocks, parameter init with hoisted weight prep)
# ----------------------------------------------------------------------------
def im2col(x_nhwc, kh, kw, stride, pad):
    # TODO(synk): im2col materializes a kh*kw-expanded (bf16) activation in
    # HBM; a direct conv with a kh*kw reduction grid axis would avoid it.
    N, H, W, C = x_nhwc.shape
    xp = jnp.pad(x_nhwc, ((0, 0), (pad, pad), (pad, pad), (0, 0)))
    Ho = (H + 2 * pad - kh) // stride + 1
    Wo = (W + 2 * pad - kw) // stride + 1
    patches = [xp[:, i:i + stride * Ho:stride, j:j + stride * Wo:stride, :]
               for i in range(kh) for j in range(kw)]
    cols = jnp.stack(patches, axis=3).reshape(N * Ho * Wo, kh * kw * C)
    return cols, (N, Ho, Wo)


def conv_bn_act(x_nhwc, cp, stride, pad, relu=True, residual=None):
    """conv (no bias) + folded eval-mode BN + optional residual + optional ReLU.

    `cp` holds pre-transposed / channel-padded bf16 weights and folded BN
    scale/bias prepared once at init; activations stay channel-padded bf16.
    """
    kh, kw = cp['ksize']
    cols, (N, Ho, Wo) = im2col(x_nhwc, kh, kw, stride, pad)
    res_flat = None
    if residual is not None:
        res_flat = residual.reshape(N * Ho * Wo, residual.shape[-1])
    y = fused_matmul(cols, cp['wmat'], cp['scale'], cp['bias'],
                     residual=res_flat, apply_relu=relu)
    return y.reshape(N, Ho, Wo, cp['wmat'].shape[1])


def basic_block(x, bp):
    stride = bp['stride']
    identity = x
    out = conv_bn_act(x, bp['conv1'], stride, 1, relu=True)
    if 'down' in bp:
        identity = conv_bn_act(x, bp['down'], stride, 0, relu=False)
    # second conv: BN + residual add + ReLU fused into the matmul epilogue
    out = conv_bn_act(out, bp['conv2'], 1, 1, relu=True, residual=identity)
    return out


def _fold_bn(bn, cout_pad):
    gamma, beta, mean, var = bn
    scale = gamma / jnp.sqrt(var + 1e-5)
    bias = beta - mean * scale
    c = scale.shape[0]
    scale_p = jnp.zeros((1, cout_pad), jnp.float32).at[0, :c].set(scale)
    bias_p = jnp.zeros((1, cout_pad), jnp.float32).at[0, :c].set(bias)
    return scale_p, bias_p


def _prep_conv(w_pt, bn, cin_pad):
    """Transpose / channel-pad / bf16-cast a PyTorch-layout conv weight and
    fold its BatchNorm, once at init (hoisted out of the forward path)."""
    cout, cin, kh, kw = w_pt.shape
    cout_pad = _round_up(cout, 128)
    w = jnp.transpose(w_pt, (2, 3, 1, 0))                    # (kh, kw, cin, cout)
    w = jnp.zeros((kh, kw, cin_pad, cout_pad),
                  jnp.float32).at[:, :, :cin, :cout].set(w)
    wmat = w.reshape(kh * kw * cin_pad, cout_pad).astype(jnp.bfloat16)
    scale, bias = _fold_bn(bn, cout_pad)
    return {'wmat': wmat, 'scale': scale, 'bias': bias,
            'ksize': (kh, kw), 'cout': cout}


def init_resnet18_params(key, num_classes=NUM_CLASSES):
    # TODO(synk): torchvision pretrained weights are not loadable in-script;
    # parameters are synthetic but shape-identical to resnet18 (eval-mode BN).
    keys = iter(jax.random.split(key, 64))

    def conv_w(cout, cin, kh, kw):
        fan_in = cin * kh * kw
        return jax.random.normal(next(keys), (cout, cin, kh, kw),
                                 jnp.float32) / jnp.sqrt(fan_in)

    def bn(c):
        k1, k2, k3, k4 = jax.random.split(next(keys), 4)
        return (1.0 + 0.1 * jax.random.normal(k1, (c,), jnp.float32),
                0.1 * jax.random.normal(k2, (c,), jnp.float32),
                0.1 * jax.random.normal(k3, (c,), jnp.float32),
                1.0 + 0.1 * jax.random.uniform(k4, (c,), jnp.float32))

    params = {'conv1': _prep_conv(conv_w(64, 3, 7, 7), bn(64), cin_pad=3),
              'layers': []}
    cfg = [(64, 64, 1), (64, 128, 2), (128, 256, 2), (256, 512, 2)]
    for cin, cout, stride in cfg:
        blocks = []
        for b in range(2):
            s = stride if b == 0 else 1
            ci = cin if b == 0 else cout
            ci_pad = _round_up(ci, 128)
            bp = {
                'stride': s,
                'conv1': _prep_conv(conv_w(cout, ci, 3, 3), bn(cout), ci_pad),
                'conv2': _prep_conv(conv_w(cout, cout, 3, 3), bn(cout),
                                    _round_up(cout, 128)),
            }
            if s != 1 or ci != cout:
                bp['down'] = _prep_conv(conv_w(cout, ci, 1, 1), bn(cout),
                                        ci_pad)
            blocks.append(bp)
        params['layers'].append(blocks)
    params['fc_w'] = jax.random.normal(next(keys), (num_classes, 512),
                                       jnp.float32) / jnp.sqrt(512.0)
    params['fc_b'] = 0.01 * jax.random.normal(next(keys), (num_classes,),
                                              jnp.float32)
    return params


def resnet_forward(params, x_nchw):
    """Mirrors ResNet.forward: returns (emb, out) with the trailing squeeze()s."""
    # NCHW -> NHWC, bf16 end-to-end for activations.
    x = jnp.transpose(x_nchw, (0, 2, 3, 1)).astype(jnp.bfloat16)
    x = conv_bn_act(x, params['conv1'], stride=2, pad=3, relu=True)
    x = maxpool2d_3x3_s2_p1(x)
    for blocks in params['layers']:
        for bp in blocks:
            x = basic_block(x, bp)
    # crop channel padding once (no-op for 512), upcast, adaptive avg-pool.
    last_cout = params['layers'][-1][-1]['conv2']['cout']
    x = x[..., :last_cout].astype(jnp.float32)
    emb = jnp.mean(x, axis=(1, 2))                       # (N, 512)
    # final fc (N,512)@(512,40): too small for a pallas_call to pay off.
    out = emb @ params['fc_w'].T + params['fc_b']
    # .squeeze() on (N,512) / (N,num_classes) for N>1 -> unchanged shapes.
    return jnp.squeeze(emb), jnp.squeeze(out)


# ----------------------------------------------------------------------------
if __name__ == "__main__":
    key = jax.random.PRNGKey(0)
    k_param, k_x, k_a, k_b, k_r = jax.random.split(key, 5)

    # Quick self-check of the fused matmul kernel (bf16 operands, bf16 out).
    P, K, C = 48, 147, 128
    a = jax.random.normal(k_a, (P, K), jnp.float32).astype(jnp.bfloat16)
    b = jax.random.normal(k_b, (K, C), jnp.float32).astype(jnp.bfloat16)
    sc = jnp.linspace(0.5, 1.5, C, dtype=jnp.float32).reshape(1, C)
    bi = jnp.linspace(-0.1, 0.1, C, dtype=jnp.float32).reshape(1, C)
    res = jax.random.normal(k_r, (P, C), jnp.float32).astype(jnp.bfloat16)

    got = fused_matmul(a, b, sc, bi, residual=res, apply_relu=True)
    ref = jnp.maximum(
        jnp.dot(a.astype(jnp.float32), b.astype(jnp.float32)) * sc + bi
        + res.astype(jnp.float32), 0.0)
    assert jnp.allclose(got.astype(jnp.float32), ref, rtol=2e-2, atol=1e-1), \
        "fused matmul mismatch"

    got2 = fused_matmul(a, b, sc, bi, apply_relu=False)
    ref2 = jnp.dot(a.astype(jnp.float32), b.astype(jnp.float32)) * sc + bi
    assert jnp.allclose(got2.astype(jnp.float32), ref2, rtol=2e-2, atol=1e-1), \
        "matmul mismatch"

    params = init_resnet18_params(k_param, num_classes=NUM_CLASSES)
    x = jax.random.normal(k_x, (2, 3, 32, 32), jnp.float32)  # NCHW input

    fwd = jax.jit(lambda inp: resnet_forward(params, inp))
    emb, out = fwd(x)
    emb, out = jax.block_until_ready(emb), jax.block_until_ready(out)

    assert emb.shape == (2, 512), emb.shape
    assert out.shape == (2, NUM_CLASSES), out.shape
    assert bool(jnp.isfinite(emb).all()) and bool(jnp.isfinite(out).all())
    print("KERNEL_OK")
</pallas_src>

<mosaic_0001>
module attributes {stable_mosaic.version = 11 : i64} {
  func.func @_fused_matmul_res_kernel(%arg0: i32, %arg1: i32, %arg2: i32, %arg3: memref<48x147xbf16, #tpu.memory_space<vmem>>, %arg4: memref<147x128xbf16, #tpu.memory_space<vmem>>, %arg5: memref<1x128xf32, #tpu.memory_space<vmem>>, %arg6: memref<1x128xf32, #tpu.memory_space<vmem>>, %arg7: memref<48x128xbf16, #tpu.memory_space<vmem>>, %arg8: memref<48x128xbf16, #tpu.memory_space<vmem>>, %arg9: memref<48x128xf32, #tpu.memory_space<vmem>>) attributes {dimension_semantics = [#tpu.dimension_semantics<parallel>, #tpu.dimension_semantics<parallel>, #tpu.dimension_semantics<arbitrary>], iteration_bounds = array<i64: 1, 1, 1>, scalar_prefetch = 0 : i64, scratch_operands = 1 : i64, tpu.core_type = #tpu.core_type<tc>, window_params = [{transform_indices = @transform_0, window_bounds = array<i64: 48, 147>}, {transform_indices = @transform_1, window_bounds = array<i64: 147, 128>}, {transform_indices = @transform_2, window_bounds = array<i64: 1, 128>}, {transform_indices = @transform_3, window_bounds = array<i64: 1, 128>}, {transform_indices = @transform_4, window_bounds = array<i64: 48, 128>}, {transform_indices = @transform_5, window_bounds = array<i64: 48, 128>}]} {
    %c0_i32 = arith.constant 0 : i32
    %0 = arith.cmpi eq, %arg2, %c0_i32 : i32
    %1 = arith.extui %0 : i1 to i32
    %c0_i32_0 = arith.constant 0 : i32
    %2 = arith.cmpi ne, %1, %c0_i32_0 : i32
    scf.if %2 {
      %cst_10 = arith.constant 0.000000e+00 : f32
      %12 = vector.broadcast %cst_10 : f32 to vector<48x128xf32>
      %c0_11 = arith.constant 0 : index
      %c0_12 = arith.constant 0 : index
      %13 = vector.load %arg9[%c0_11, %c0_12] : memref<48x128xf32, #tpu.memory_space<vmem>>, vector<48x128xf32>
      tpu.vector_store %arg9[%c0_11, %c0_12], %12 {strides = array<i32>} : memref<48x128xf32, #tpu.memory_space<vmem>>, vector<48x128xf32>,
    } else {
    }
    %c0 = arith.constant 0 : index
    %c0_1 = arith.constant 0 : index
    %3 = vector.load %arg9[%c0, %c0_1] : memref<48x128xf32, #tpu.memory_space<vmem>>, vector<48x128xf32>
    %c0_2 = arith.constant 0 : index
    %c0_3 = arith.constant 0 : index
    %4 = vector.load %arg3[%c0_2, %c0_3] : memref<48x147xbf16, #tpu.memory_space<vmem>>, vector<48x147xbf16>
    %c0_4 = arith.constant 0 : index
    %c0_5 = arith.constant 0 : index
    %5 = vector.load %arg4[%c0_4, %c0_5] : memref<147x128xbf16, #tpu.memory_space<vmem>>, vector<147x128xbf16>
    %cst = arith.constant dense<0.000000e+00> : vector<48x128xf32>
    %6 = tpu.matmul %4, %5, %cst {dimension_numbers = #tpu.dot_dimension_numbers<[1], [0], [0], [1], [0, 0, 1, 1], [], []>} : vector<48x147xbf16>, vector<147x128xbf16>, vector<48x128xf32> -> vector<48x128xf32>
    %7 = arith.addf %3, %6 : vector<48x128xf32>
    %c0_6 = arith.constant 0 : index
    %c0_7 = arith.constant 0 : index
    %8 = vector.load %arg9[%c0_6, %c0_7] : memref<48x128xf32, #tpu.memory_space<vmem>>, vector<48x128xf32>
    tpu.vector_store %arg9[%c0_6, %c0_7], %7 {strides = array<i32>} : memref<48x128xf32, #tpu.memory_space<vmem>>, vector<48x128xf32>,
    %c0_i32_8 = arith.constant 0 : i32
    %9 = arith.cmpi eq, %arg2, %c0_i32_8 : i32
    %10 = arith.extui %9 : i1 to i32
    %c0_i32_9 = arith.constant 0 : i32
    %11 = arith.cmpi ne, %10, %c0_i32_9 : i32
    scf.if %11 {
      %c0_10 = arith.constant 0 : index
      %c0_11 = arith.constant 0 : index
      %12 = vector.load %arg9[%c0_10, %c0_11] : memref<48x128xf32, #tpu.memory_space<vmem>>, vector<48x128xf32>
      %c0_12 = arith.constant 0 : index
      %c0_13 = arith.constant 0 : index
      %13 = vector.load %arg5[%c0_12, %c0_13] : memref<1x128xf32, #tpu.memory_space<vmem>>, vector<1x128xf32>
      %14 = vector.broadcast %13 : vector<1x128xf32> to vector<48x128xf32>
      %15 = arith.mulf %12, %14 : vector<48x128xf32>
      %c0_14 = arith.constant 0 : index
      %c0_15 = arith.constant 0 : index
      %16 = vector.load %arg6[%c0_14, %c0_15] : memref<1x128xf32, #tpu.memory_space<vmem>>, vector<1x128xf32>
      %17 = vector.broadcast %16 : vector<1x128xf32> to vector<48x128xf32>
      %18 = arith.addf %15, %17 : vector<48x128xf32>
      %c0_16 = arith.constant 0 : index
      %c0_17 = arith.constant 0 : index
      %19 = vector.load %arg7[%c0_16, %c0_17] : memref<48x128xbf16, #tpu.memory_space<vmem>>, vector<48x128xbf16>
      %20 = arith.extf %19 : vector<48x128xbf16> to vector<48x128xf32>
      %21 = arith.addf %18, %20 : vector<48x128xf32>
      %cst_18 = arith.constant 0.000000e+00 : f32
      %22 = vector.broadcast %cst_18 : f32 to vector<48x128xf32>
      %23 = arith.maximumf %21, %22 : vector<48x128xf32>
      %24 = arith.truncf %23 : vector<48x128xf32> to vector<48x128xbf16>
      %c0_19 = arith.constant 0 : index
      %c0_20 = arith.constant 0 : index
      %25 = vector.load %arg8[%c0_19, %c0_20] : memref<48x128xbf16, #tpu.memory_space<vmem>>, vector<48x128xbf16>
      tpu.vector_store %arg8[%c0_19, %c0_20], %24 {strides = array<i32>} : memref<48x128xbf16, #tpu.memory_space<vmem>>, vector<48x128xbf16>,
    } else {
    }
    return
  }
  func.func @transform_0(%arg0: i32, %arg1: i32, %arg2: i32) -> (i32, i32) {
    %c0_i32 = arith.constant 0 : i32
    return %arg0, %arg2 : i32, i32
  }
  func.func @transform_1(%arg0: i32, %arg1: i32, %arg2: i32) -> (i32, i32) {
    %c0_i32 = arith.constant 0 : i32
    return %arg2, %arg1 : i32, i32
  }
  func.func @transform_2(%arg0: i32, %arg1: i32, %arg2: i32) -> (i32, i32) {
    %c0_i32 = arith.constant 0 : i32
    %c0_i32_0 = arith.constant 0 : i32
    return %c0_i32, %arg1 : i32, i32
  }
  func.func @transform_3(%arg0: i32, %arg1: i32, %arg2: i32) -> (i32, i32) {
    %c0_i32 = arith.constant 0 : i32
    %c0_i32_0 = arith.constant 0 : i32
    return %c0_i32, %arg1 : i32, i32
  }
  func.func @transform_4(%arg0: i32, %arg1: i32, %arg2: i32) -> (i32, i32) {
    %c0_i32 = arith.constant 0 : i32
    return %arg0, %arg1 : i32, i32
  }
  func.func @transform_5(%arg0: i32, %arg1: i32, %arg2: i32) -> (i32, i32) {
    %c0_i32 = arith.constant 0 : i32
    return %arg0, %arg1 : i32, i32
  }
}

</mosaic_0001>

<bundles_post_ra>
// kernel: tpu_custom_call.1
= control target key start
LH: loop header
LB: loop body
LE: loop exit
PB: predicated region body
PF: predicated region fallthrough
CT: control target
= control target key end

     0   :  { %10 = vsyncpa [#allocation4], 0  ;;  %s663_s0 = inlined_call_operand.hbm [shape: bf16[48,147], index: 0, kind: input, shape index: {}]   ;;  %s664_s1 = inlined_call_operand.hbm [shape: bf16[147,128], index: 1, kind: input, shape index: {}]   ;;  %s665_s2 = inlined_call_operand.vmem [shape: f32[1,128], index: 2, kind: input, shape index: {}]   ;;  %s666_s3 = inlined_call_operand.vmem [shape: f32[1,128], index: 3, kind: input, shape index: {}]   ;;  %s667_s4 = inlined_call_operand.hbm [shape: bf16[48,128], index: 4, kind: input, shape index: {}]   ;;  %s668_s5 = inlined_call_operand.hbm [shape: bf16[48,128], index: 5, kind: output, shape index: {}]  }
   0x1   :  { %11 = vsyncpa [#allocation7], 0  ;;  %s30_s20 = sshll.u32 %s664_s1, 4  ;;  %s31_s20 = int_to_ptr.hbm [resolvable:$true] %s30_s20 }
   0x2   :  { %12 = vsyncpa [#allocation5], 0  ;;  %s594_s21 = smov [#allocation6]   ;;  %s17_s25 = sshll.u32 %s663_s0, 4  ;;  %s18_s25 = int_to_ptr.hbm [resolvable:$true] %s17_s25 }
   0x3   :  { %s32_s22 = sshll.u32 %s594_s21, 4  ;;  %s595_s26 = smov 64   ;;  %s33_s22 = int_to_ptr.vmem [resolvable:$true] %s32_s22 }
   0x4   :  { %s596_s27 = smov 4   ;;  %s597_s28 = smov [#allocation3]  }
   0x5   :  { %38 = dma.hbm_to_vmem [thread:$0]  %s31_s20, 1216, %s33_s22, [#allocation7], %s595_s26, %s595_s26, %s596_s27  }
   0x6   :  { %s19_s29 = sshll.u32 %s597_s28, 4  ;;  %s598_s1 = smov 128   ;;  %s20_s29 = int_to_ptr.vmem [resolvable:$true] %s19_s29 }
   0x7   :  { %s599_s30 = smov 8   ;;  %s47_s8 = sshll.u32 %s667_s4, 4  ;;  %s48_s8 = int_to_ptr.hbm [resolvable:$true] %s47_s8 }
   0x8   :  { %25 = dma.hbm_to_vmem [thread:$0]  %s18_s25, 768, %s20_s29, [#allocation4], %s598_s1, %s598_s1, %s599_s30  }
   0x9   :  { %s600_s9 = smov [#allocation8]  }
   0xa   :  { %s49_s0 = sshll.u32 %s600_s9, 4  ;;  %s50_s0 = int_to_ptr.vmem [resolvable:$true] %s49_s0 }
   0xb   :  { %55 = dma.hbm_to_vmem [thread:$0]  %s48_s8, 384, %s50_s0, [#allocation7], %s595_s26, %s595_s26, %s596_s27  }
   0xc   :  { %588 = dma.done.wait [#allocation4], 768  }
   0xd   :  { %589 = vsyncadd [#allocation4], 4294966528 }
   0xe   :  { %590 = dma.done.wait [#allocation7], 1600  }
   0xf   :  { %591 = vsyncadd [#allocation7], 4294965696  ;;  %vm204_vm0 = vcmask 1040384   ;;  %vm205_vm1 = vcmask 1041408   ;;  %v601_v0 = vmov 65535   ;;  %v432_v2 = vld [vmem:[#allocation6 + $0x38] sm:$0xff] }
  0x10   :  { %v206_v1 = vsel %vm204_vm0, 4294967295, %v601_v0  ;;  %v109_v3 = vld [vmem:[#allocation6 + $0x48] sm:$0x3]  ;;  %211 = vmatpush.bf16.msra.mxu0 %v432_v2  ;;  %465 = vmatpush.bf16.msra.mxu2 %v432_v2  ;;  %v431_v5 = vld [vmem:[#allocation6 + $0x30] sm:$0xff]  ;;  %v433_v10 = vld [vmem:[#allocation6 + $0x40] sm:$0xff]  ;;  %vm194_vm2 = vcmask 154624  }
  0x11   :  { %v174_v4 = vunpack.c.l.b16 %v109_v3  ;;  %v207_v6 = vsel %vm205_vm1, %v206_v1, 0  ;;  %466 = vmatpush.bf16.msra.mxu3 %v432_v2  ;;  %v430_v9 = vld [vmem:[#allocation6 + $0x28] sm:$0xff]  ;;  %v419_v11 = vld [vmem:[#allocation3 + $0x4] sm:$0xf]  ;;  %v360_v12 = vld [vmem:[#allocation3 + $0x8] sm:$0xf0] }
  0x12   :  { %v363_v13 = vor.u32 %v419_v11, %v360_v12  ;;  %v429_v14 = vld [vmem:[#allocation6 + $0x20] sm:$0xff]  ;;  %v428_v15 = vld [vmem:[#allocation6 + $0x18] sm:$0xff]  ;;  %v427_v16 = vld [vmem:[#allocation6 + $0x10] sm:$0xff]  ;;  %s342_s15 = sshll.u32 %s668_s5, 4  ;;  %s343_s15 = int_to_ptr.hbm [resolvable:$true] %s342_s15 }
  0x13   :  { %v184_v7 = vpack.c.b16 %v174_v4, %v174_v4  ;;  %v426_v17 = vld [vmem:[#allocation6 + $0x8] sm:$0xff]  ;;  %v421_v18 = vld [vmem:[#allocation3 + $0x14] sm:$0xf]  ;;  %v358_v22 = vld [vmem:[#allocation3] sm:$0xf] }
  0x14   :  { %212 = vmatpush.bf16.msra.mxu0 %v431_v5  ;;  %467 = vmatpush.bf16.msra.mxu2 %v431_v5  ;;  %v368_v19 = vld [vmem:[#allocation3 + $0x18] sm:$0xf0]  ;;  %v425_v20 = vld [vmem:[#allocation6] sm:$0xff]  ;;  %v420_v23 = vld [vmem:[#allocation3 + $0x4] sm:$0xf0] }
  0x15   :  { %v209_v8 = vand.u32 %v207_v6, %v184_v7  ;;  %468 = vmatpush.bf16.msra.mxu3 %v431_v5  ;;  %v371_v21 = vor.u32 %v421_v18, %v368_v19  ;;  %v366_v24 = vld [vmem:[#allocation3 + $0x10] sm:$0xf]  ;;  %v422_v25 = vld [vmem:[#allocation3 + $0x14] sm:$0xf0]  ;;  %v374_v26 = vld [vmem:[#allocation3 + $0x20] sm:$0xf]  ;;  %v359_v28 = vor.u32 %v420_v23, %v358_v22 }
  0x16   :  { %v424_v27 = vld [vmem:[#allocation3 + $0x24] sm:$0xf0]  ;;  %v367_v29 = vor.u32 %v422_v25, %v366_v24  ;;  %v423_v31 = vld [vmem:[#allocation3 + $0x24] sm:$0xf]  ;;  %v376_v32 = vld [vmem:[#allocation3 + $0x28] sm:$0xf0] }
  0x17   :  { %241 = vmatpush.bf16.msra.mxu1 %v209_v8  ;;  %v375_v30 = vor.u32 %v424_v27, %v374_v26  ;;  %v379_v33 = vor.u32 %v423_v31, %v376_v32  ;;  %v490_v39 = vld [vmem:[%s665_s2] ss:$0 sm:$0xff]  ;;  %v461_v55 = vld [vmem:[#allocation8 + $0x8] sm:$0xff]   ;;  %v462_v6 = vld [vmem:[#allocation8 + $0x10] sm:$0xff]   ;;  %s602_s2 = smov [#allocation9]  }
  0x18   :  { %213 = vmatpush.bf16.msra.mxu0 %v430_v9  ;;  %469 = vmatpush.bf16.msra.mxu2 %v430_v9  ;;  %v491_v41 = vld [vmem:[%s666_s3] ss:$0 sm:$0xff]  ;;  %v440_v62 = vunpack.c.l.bf16 %v461_v55  ;;  %v441_v4 = vunpack.c.h.bf16 %v461_v55  ;;  %v444_v12 = vunpack.c.l.bf16 %v462_v6  ;;  %v445_v18 = vunpack.c.h.bf16 %v462_v6  ;;  %s340_s3 = sshll.u32 %s602_s2, 4  ;;  %s341_s3 = int_to_ptr.vmem [resolvable:$true] %s340_s3 }
  0x19   :  { %470 = vmatpush.bf16.msra.mxu3 %v430_v9  ;;  %v435_v43 = vld [vmem:[#allocation8] sm:$0xff]  }
  0x1a   :  { %v436_v48 = vunpack.c.l.bf16 %v435_v43  ;;  %v437_v52 = vunpack.c.h.bf16 %v435_v43 }
  0x1b   :  { %242 = vmatpush.bf16.msra.mxu1 %v433_v10 }
  0x1c   :  { %214 = vmatpush.bf16.msra.mxu0 %v429_v14  ;;  %471 = vmatpush.bf16.msra.mxu2 %v429_v14 }
  0x1d   :  { %472 = vmatpush.bf16.msra.mxu3 %v429_v14 }
  0x1e   :  { %416 = vmatmul.msk.bf16.vlgmr.msra.gmra.mxu1 %vm194_vm2, %v363_v13 }
  0x20   :  { %215 = vmatpush.bf16.msra.mxu0 %v428_v15  ;;  %473 = vmatpush.bf16.msra.mxu2 %v428_v15 }
  0x21   :  { %474 = vmatpush.bf16.msra.mxu3 %v428_v15 }
  0x24   :  { %216 = vmatpush.bf16.msra.mxu0 %v427_v16  ;;  %475 = vmatpush.bf16.msra.mxu2 %v427_v16 }
  0x25   :  { %476 = vmatpush.bf16.msra.mxu3 %v427_v16 }
  0x28   :  { %217 = vmatpush.bf16.msra.mxu0 %v426_v17  ;;  %477 = vmatpush.bf16.msra.mxu2 %v426_v17 }
  0x29   :  { %478 = vmatpush.bf16.msra.mxu3 %v426_v17 }
  0x2c   :  { %218 = vmatpush.bf16.msra.mxu0 %v425_v20  ;;  %479 = vmatpush.bf16.msra.mxu2 %v425_v20 }
  0x2d   :  { %480 = vmatpush.bf16.msra.mxu3 %v425_v20 }
  0x2e   :  { %417 = vmatmul.msk.bf16.gmra.mxu1 %vm194_vm2, %v371_v21 }
  0x2f   :  { %219 = vmatmul.bf16.vlgmr.msra.gmra.mxu0 %v359_v28  ;;  %224 = vmatmul.bf16.vlgmr.msra.gmra.mxu2 %v367_v29 }
  0x30   :  { %229 = vmatmul.bf16.vlgmr.msra.gmra.mxu3 %v375_v30 }
  0x3e   :  { %418 = vmatmul.msk.bf16.gmra.mxu1 %vm194_vm2, %v379_v33 }
  0x9b   :  { %v244_v34 = vpop.f32.mrf.mxu1 }
  0xa3   :  { %v246_v35 = vpop.f32.mrf.mxu1 }
  0xab   :  { %v249_v36 = vpop.f32.mrf.mxu1 }
  0xac   :  { %v220_v37 = vpop.f32.mrf.mxu0 }
  0xad   :  { %v245_v38 = vadd.f32 %v244_v34, %v220_v37 }
  0xaf   :  { %v284_v40 = vmul.f32 %v490_v39, %v245_v38 }
  0xb1   :  { %v294_v47 = vadd.f32 %v491_v41, %v284_v40 }
  0xb2   :  { %v225_v44 = vpop.f32.mrf.mxu2 }
  0xb3   :  { %v251_v42 = vpop.f32.mrf.mxu1  ;;  %v250_v45 = vadd.f32 %v249_v36, %v225_v44  ;;  %v230_v50 = vpop.f32.mrf.mxu3  ;;  %v312_v54 = vadd.f32 %v436_v48, %v294_v47 }
  0xb4   :  { %v222_v46 = vpop.f32.mrf.mxu0 }
  0xb5   :  { %v247_v49 = vadd.f32 %v246_v35, %v222_v46  ;;  %v286_v53 = vmul.f32 %v490_v39, %v250_v45  ;;  %v318_v0 = vmax.f32 %v312_v54, 0.0 }
  0xb7   :  { %v285_v51 = vmul.f32 %v490_v39, %v247_v49  ;;  %v296_v61 = vadd.f32 %v491_v41, %v286_v53 }
  0xb9   :  { %v295_v56 = vadd.f32 %v491_v41, %v285_v51  ;;  %v314_v7 = vadd.f32 %v440_v62, %v296_v61 }
  0xba   :  { %v227_v60 = vpop.f32.mrf.mxu2 }
  0xbb   :  { %v254_v57 = vpop.f32.mrf.mxu1  ;;  %v313_v59 = vadd.f32 %v437_v52, %v295_v56  ;;  %v252_v63 = vadd.f32 %v251_v42, %v227_v60  ;;  %v232_v9 = vpop.f32.mrf.mxu3  ;;  %v320_v15 = vmax.f32 %v314_v7, 0.0 }
  0xbc   :  { %v255_v58 = vadd.f32 %v254_v57, %v230_v50 }
  0xbd   :  { %v319_v1 = vmax.f32 %v313_v59, 0.0  ;;  %v287_v3 = vmul.f32 %v490_v39, %v252_v63 }
  0xbe   :  { %v288_v2 = vmul.f32 %v490_v39, %v255_v58 }
  0xbf   :  { %v449_v5 = vpack.c.bf16 %v319_v1, %v318_v0  ;;  %v297_v8 = vadd.f32 %v491_v41, %v287_v3 }
  0xc0   :  { %v298_v11 = vadd.f32 %v491_v41, %v288_v2 }
  0xc1   :  { %450 = vst [vmem:[#allocation9] sm:$0xff] %v449_v5   ;;  %v315_v13 = vadd.f32 %v441_v4, %v297_v8 }
  0xc2   :  { %v316_v19 = vadd.f32 %v444_v12, %v298_v11 }
  0xc3   :  { %v256_v10 = vpop.f32.mrf.mxu1  ;;  %v321_v16 = vmax.f32 %v315_v13, 0.0 }
  0xc4   :  { %v257_v14 = vadd.f32 %v256_v10, %v232_v9  ;;  %v322_v23 = vmax.f32 %v316_v19, 0.0 }
  0xc5   :  { %v454_v20 = vpack.c.bf16 %v321_v16, %v320_v15 }
  0xc6   :  { %v289_v17 = vmul.f32 %v490_v39, %v257_v14 }
  0xc7   :  { %463 = vst [vmem:[#allocation9 + $0x8] sm:$0xff] %v454_v20  }
  0xc8   :  { %v299_v21 = vadd.f32 %v491_v41, %v289_v17 }
  0xca   :  { %v317_v22 = vadd.f32 %v445_v18, %v299_v21 }
  0xcc   :  { %v323_v24 = vmax.f32 %v317_v22, 0.0 }
  0xce   :  { %v459_v25 = vpack.c.bf16 %v323_v24, %v322_v23 }
  0xd0   :  { %464 = vst [vmem:[#allocation9 + $0x10] sm:$0xff] %v459_v25  }
  0xd1   :  { %348 = dma.vmem_to_hbm [thread:$0]  %s341_s3, 384, %s343_s15, [#allocation5], %s595_s26, %s595_s26, %s596_s27  }
  0xd2   :  { %592 = dma.done.wait [#allocation5], 384  }
  0xd3   :  { %593 = vsyncadd [#allocation5], 4294966912 }
  0xd4   :  { %353 = vsyncpa [#allocation4], 1 }
  0xd5   :  { %354 = vsyncpa [#allocation7], 1 }
  0xd6   :  { %355 = vsyncpa [#allocation5], 1 }

</bundles_post_ra>
